<compile_context>
chip_gen: v5e
topology: v5e:2x2
jax: 0.10.0
libtpu: 0.0.40
codegen_flags: <defaults>
</compile_context>

<pallas_src>
import functools
import math

import jax
import jax.numpy as jnp
from jax.experimental import pallas as pl
from jax.experimental.pallas import tpu as pltpu

K = 3  # depthwise conv kernel size, padding = K // 2 = 1


def _round_up(a, b):
    return (a + b - 1) // b * b


def _cpe_kernel(x_ref, w_ref, b_ref, o_ref, pad_ref, *, H, W, pad_front, chunk):
    """Fused CPVT positional-encoding block.

    x_ref   : (TB, S, TD)  raw tokens (class token at row 0), S = 1 + H*W
    w_ref   : (K*K, TD)    depthwise 3x3 weights, tap-major, channels on lanes
    b_ref   : (1, TD)      bias
    o_ref   : (TB, S, TD)  output tokens (class token copied through)
    pad_ref : (TB, L, TD)  f32 halo-padded scratch (image tokens + zero halos)
    """
    TB, S, TD = x_ref.shape
    HW = H * W
    L = pad_ref.shape[1]

    # ---- 1. fill halo-padded f32 scratch (single upcast pass, zero halos) ----
    pad_ref[:, :pad_front, :] = jnp.zeros((TB, pad_front, TD), jnp.float32)
    pad_ref[:, pad_front + HW:, :] = jnp.zeros(
        (TB, L - pad_front - HW, TD), jnp.float32)
    pad_ref[:, pad_front:pad_front + HW, :] = x_ref[:, 1:1 + HW, :].astype(jnp.float32)

    # ---- 2. hoisted per-tap weights, bias, and full-lane-width column masks ----
    w_all = w_ref[...].astype(jnp.float32)                 # (K*K, TD)
    w_rows = [w_all[t:t + 1, :] for t in range(K * K)]     # 9 x (1, TD)
    bias = b_ref[...].astype(jnp.float32)                  # (1, TD)

    q = jax.lax.broadcasted_iota(jnp.int32, (chunk, TD), 0)
    colq = (q + (W - 1)) % W          # column of image token at local row q
    mask_left = colq != 0             # valid for taps with dw = -1
    mask_right = colq != (W - 1)      # valid for taps with dw = +1

    def compute_rows(b, start, length):
        # `length` is static; `start` is a multiple of `chunk` (hence of 8 and W).
        if not isinstance(start, int):
            start = pl.multiple_of(start, 8)
        acc = None
        for kh in range(K):
            dh = kh - 1
            for kw in range(K):
                dw = kw - 1
                # output row r reads scratch row (r - 1) + pad_front + dh*W + dw;
                # all reads are in-bounds, zero halos implement the row padding,
                # only column wrap needs masking.
                off = pad_front - 1 + dh * W + dw
                tap = pad_ref[b, pl.ds(start + off, length), :]
                if dw == -1:
                    tap = jnp.where(mask_left[:length], tap, 0.0)
                elif dw == 1:
                    tap = jnp.where(mask_right[:length], tap, 0.0)
                term = tap * w_rows[kh * K + kw]
                acc = term if acc is None else acc + term
        acc = acc + bias
        # aligned dense store (start is a multiple of 8; row 0's garbage conv
        # value is overwritten by the class-token copy below).
        o_ref[b, pl.ds(start, length), :] = acc.astype(o_ref.dtype)

    n_full = S // chunk
    rem = S - n_full * chunk

    if n_full > 0:
        def body(i, carry):
            b = i // n_full
            c = i - b * n_full
            compute_rows(b, c * chunk, chunk)
            return carry

        jax.lax.fori_loop(0, TB * n_full, body, 0)

    if rem > 0:
        def rem_body(b, carry):
            compute_rows(b, n_full * chunk, rem)
            return carry

        jax.lax.fori_loop(0, TB, rem_body, 0)

    # ---- 3. class token passes straight through (fused concat) ----------------
    o_ref[:, :1, :] = x_ref[:, :1, :]


def _pick_tiles(B, S, D, b_block=None, d_block=None):
    # channel tile: lane-dense multiple of 128 that divides D, else all of D
    if d_block is None:
        d_block = D
        if D % 128 == 0:
            for cand in (512, 384, 256, 128):
                if D % cand == 0:
                    d_block = cand
                    break
    assert D % d_block == 0, "d_block must divide d_model"

    if b_block is None:
        # Size against f32 (the halo scratch / accumulator dominate) and keep the
        # block ~<= 2 MiB so in/out double buffers + scratch fit v7x's 64 MiB VMEM.
        per_image = S * d_block * 4
        b_block = max(1, min(B, (2 * 1024 * 1024) // max(per_image, 1), 8))
        while B % b_block != 0:
            b_block -= 1
        # v7x has two TensorCores: keep >= 2 parallel grid steps when possible.
        while (B // b_block) * (D // d_block) < 2 and b_block > 1:
            b_block -= 1
            while B % b_block != 0:
                b_block -= 1
    assert B % b_block == 0, "b_block must divide batch size"
    return b_block, d_block


def conditional_positional_encoding(x, weight, bias, *, b_block=None, d_block=None):
    """x: (B, S, D) with S = 1 + H*W; weight: (D, 1, K, K); bias: (D,)."""
    B, S, D = x.shape
    hw = S - 1
    H = W = int(math.sqrt(hw))
    assert H * W == hw, "Sequence length must be a perfect square plus one"

    TB, TD = _pick_tiles(B, S, D, b_block, d_block)

    # PyTorch depthwise weight (D, 1, K, K) -> (K*K, D), tap-major, channels on lanes
    w2 = weight.reshape(D, K * K).T
    b2 = bias.reshape(1, D)

    # Halo-padded scratch geometry: front pad rounded up to a sublane multiple so
    # the bulk image-token copy into the scratch is an aligned dense store.
    pad_front = _round_up(W + 2, 8)
    L = _round_up(pad_front + hw + W + 2, 8)

    # Register-blocking chunk: multiple of lcm(8, W) (aligned stores + hoistable
    # column masks), sized so the per-chunk f32 accumulator stays ~<= 16 vregs.
    lcm_w = 8 * W // math.gcd(8, W)
    rows_cap = max(1, (16 * 1024) // TD)
    chunk = max(lcm_w, (rows_cap // lcm_w) * lcm_w)
    chunk = min(chunk, _round_up(S, lcm_w))

    in_bytes = TB * S * TD * x.dtype.itemsize
    scratch_bytes = TB * L * TD * 4
    vmem_limit = int(min(48 * 2**20,
                         max(32 * 2**20, 4 * in_bytes + scratch_bytes + (2 << 20))))

    kernel = functools.partial(_cpe_kernel, H=H, W=W, pad_front=pad_front, chunk=chunk)

    return pl.pallas_call(
        kernel,
        out_shape=jax.ShapeDtypeStruct((B, S, D), x.dtype),
        grid_spec=pltpu.PrefetchScalarGridSpec(
            num_scalar_prefetch=0,
            grid=(B // TB, D // TD),
            in_specs=[
                pl.BlockSpec((TB, S, TD), lambda ib, dc: (ib, 0, dc)),
                pl.BlockSpec((K * K, TD), lambda ib, dc: (0, dc)),
                pl.BlockSpec((1, TD), lambda ib, dc: (0, dc)),
            ],
            out_specs=pl.BlockSpec((TB, S, TD), lambda ib, dc: (ib, 0, dc)),
            scratch_shapes=[pltpu.VMEM((TB, L, TD), jnp.float32)],
        ),
        compiler_params=pltpu.CompilerParams(
            dimension_semantics=("parallel", "parallel"),
            vmem_limit_bytes=vmem_limit,
        ),
    )(x, w2, b2)


def _reference(x, weight, bias):
    """Pure-JAX reference of the PyTorch forward (no residual in this module)."""
    B, S, D = x.shape
    H = W = int(math.sqrt(S - 1))
    cls_tok = x[:, :1, :]
    img = x[:, 1:, :].reshape(B, H, W, D).astype(jnp.float32)
    xp = jnp.pad(img, ((0, 0), (1, 1), (1, 1), (0, 0)))
    acc = jnp.broadcast_to(bias.astype(jnp.float32), (B, H, W, D))
    for kh in range(K):
        for kw in range(K):
            acc = acc + xp[:, kh:kh + H, kw:kw + W, :] * weight[:, 0, kh, kw].astype(jnp.float32)
    return jnp.concatenate(
        [cls_tok, acc.reshape(B, H * W, D).astype(x.dtype)], axis=1)


def _make_inputs(key, B, H, W, D):
    S = 1 + H * W
    kx, kw, kb = jax.random.split(key, 3)
    x = jax.random.normal(kx, (B, S, D), dtype=jnp.float32)
    fan_in = K * K  # Conv2d(d_model, d_model, 3, groups=d_model): 1 in-ch per group
    bound = 1.0 / math.sqrt(fan_in)
    weight = jax.random.uniform(kw, (D, 1, K, K), jnp.float32, -bound, bound)
    bias = jax.random.uniform(kb, (D,), jnp.float32, -bound, bound)
    return x, weight, bias


if __name__ == "__main__":
    key = jax.random.PRNGKey(0)
    k1, k2, k3 = jax.random.split(key, 3)

    # Config 1: small image, single channel block, remainder-only row path.
    x, w, b = _make_inputs(k1, B=2, H=4, W=4, D=128)
    out = jax.block_until_ready(conditional_positional_encoding(x, w, b))
    ref = _reference(x, w, b)
    assert out.shape == x.shape
    assert jnp.allclose(out, ref, atol=1e-5, rtol=1e-5), "mismatch (config 1)"

    # Config 2: multi-block channel grid + explicit batch blocking.
    x2, w2, b2 = _make_inputs(k2, B=4, H=8, W=8, D=256)
    out2 = jax.block_until_ready(
        conditional_positional_encoding(x2, w2, b2, b_block=2, d_block=128))
    ref2 = _reference(x2, w2, b2)
    assert out2.shape == x2.shape
    assert jnp.allclose(out2, ref2, atol=1e-5, rtol=1e-5), "mismatch (config 2)"

    # Config 3: larger image -> exercises the full-chunk fori_loop + remainder row.
    x3, w3, b3 = _make_inputs(k3, B=2, H=16, W=16, D=128)
    out3 = jax.block_until_ready(conditional_positional_encoding(x3, w3, b3))
    ref3 = _reference(x3, w3, b3)
    assert out3.shape == x3.shape
    assert jnp.allclose(out3, ref3, atol=1e-5, rtol=1e-5), "mismatch (config 3)"

    print("KERNEL_OK")
</pallas_src>

<mosaic_0001>
module attributes {stable_mosaic.version = 11 : i64} {
  func.func @_cpe_kernel(%arg0: i32, %arg1: i32, %arg2: memref<1x17x128xf32, #tpu.memory_space<vmem>>, %arg3: memref<9x128xf32, #tpu.memory_space<vmem>>, %arg4: memref<1x128xf32, #tpu.memory_space<vmem>>, %arg5: memref<1x17x128xf32, #tpu.memory_space<vmem>>, %arg6: memref<1x32x128xf32, #tpu.memory_space<vmem>>) attributes {dimension_semantics = [#tpu.dimension_semantics<parallel>, #tpu.dimension_semantics<parallel>], iteration_bounds = array<i64: 2, 1>, scalar_prefetch = 0 : i64, scratch_operands = 1 : i64, tpu.core_type = #tpu.core_type<tc>, window_params = [{transform_indices = @transform_0, window_bounds = array<i64: 1, 17, 128>}, {transform_indices = @transform_1, window_bounds = array<i64: 9, 128>}, {transform_indices = @transform_2, window_bounds = array<i64: 1, 128>}, {transform_indices = @transform_3, window_bounds = array<i64: 1, 17, 128>}]} {
    %cst = arith.constant 0.000000e+00 : f32
    %0 = vector.broadcast %cst : f32 to vector<1x8x128xf32>
    %c0 = arith.constant 0 : index
    %c0_0 = arith.constant 0 : index
    %c0_1 = arith.constant 0 : index
    %1 = vector.load %arg6[%c0, %c0_0, %c0_1] : memref<1x32x128xf32, #tpu.memory_space<vmem>>, vector<1x8x128xf32>
    tpu.vector_store %arg6[%c0, %c0_0, %c0_1], %0 {strides = array<i32>} : memref<1x32x128xf32, #tpu.memory_space<vmem>>, vector<1x8x128xf32>,
    %cst_2 = arith.constant 0.000000e+00 : f32
    %2 = vector.broadcast %cst_2 : f32 to vector<1x8x128xf32>
    %c0_3 = arith.constant 0 : index
    %c24 = arith.constant 24 : index
    %c0_4 = arith.constant 0 : index
    %3 = vector.load %arg6[%c0_3, %c24, %c0_4] : memref<1x32x128xf32, #tpu.memory_space<vmem>>, vector<1x8x128xf32>
    tpu.vector_store %arg6[%c0_3, %c24, %c0_4], %2 {strides = array<i32>} : memref<1x32x128xf32, #tpu.memory_space<vmem>>, vector<1x8x128xf32>,
    %c0_5 = arith.constant 0 : index
    %c1 = arith.constant 1 : index
    %c0_6 = arith.constant 0 : index
    %4 = vector.load %arg2[%c0_5, %c1, %c0_6] : memref<1x17x128xf32, #tpu.memory_space<vmem>>, vector<1x16x128xf32>
    %c0_7 = arith.constant 0 : index
    %c8 = arith.constant 8 : index
    %c0_8 = arith.constant 0 : index
    %5 = vector.load %arg6[%c0_7, %c8, %c0_8] : memref<1x32x128xf32, #tpu.memory_space<vmem>>, vector<1x16x128xf32>
    tpu.vector_store %arg6[%c0_7, %c8, %c0_8], %4 {strides = array<i32>} : memref<1x32x128xf32, #tpu.memory_space<vmem>>, vector<1x16x128xf32>,
    %c0_9 = arith.constant 0 : index
    %c0_10 = arith.constant 0 : index
    %6 = vector.load %arg3[%c0_9, %c0_10] : memref<9x128xf32, #tpu.memory_space<vmem>>, vector<9x128xf32>
    %7 = vector.extract_strided_slice %6 {offsets = [0, 0], sizes = [1, 128], strides = [1, 1]} : vector<9x128xf32> to vector<1x128xf32>
    %8 = vector.extract_strided_slice %6 {offsets = [1, 0], sizes = [1, 128], strides = [1, 1]} : vector<9x128xf32> to vector<1x128xf32>
    %9 = vector.extract_strided_slice %6 {offsets = [2, 0], sizes = [1, 128], strides = [1, 1]} : vector<9x128xf32> to vector<1x128xf32>
    %10 = vector.extract_strided_slice %6 {offsets = [3, 0], sizes = [1, 128], strides = [1, 1]} : vector<9x128xf32> to vector<1x128xf32>
    %11 = vector.extract_strided_slice %6 {offsets = [4, 0], sizes = [1, 128], strides = [1, 1]} : vector<9x128xf32> to vector<1x128xf32>
    %12 = vector.extract_strided_slice %6 {offsets = [5, 0], sizes = [1, 128], strides = [1, 1]} : vector<9x128xf32> to vector<1x128xf32>
    %13 = vector.extract_strided_slice %6 {offsets = [6, 0], sizes = [1, 128], strides = [1, 1]} : vector<9x128xf32> to vector<1x128xf32>
    %14 = vector.extract_strided_slice %6 {offsets = [7, 0], sizes = [1, 128], strides = [1, 1]} : vector<9x128xf32> to vector<1x128xf32>
    %15 = vector.extract_strided_slice %6 {offsets = [8, 0], sizes = [1, 128], strides = [1, 1]} : vector<9x128xf32> to vector<1x128xf32>
    %c0_11 = arith.constant 0 : index
    %c0_12 = arith.constant 0 : index
    %16 = vector.load %arg4[%c0_11, %c0_12] : memref<1x128xf32, #tpu.memory_space<vmem>>, vector<1x128xf32>
    %17 = tpu.iota {dimensions = array<i32: 0>} : vector<24x128xi32>
    %c3_i32 = arith.constant 3 : i32
    %18 = vector.broadcast %c3_i32 : i32 to vector<24x128xi32>
    %19 = arith.addi %17, %18 : vector<24x128xi32>
    %c4_i32 = arith.constant 4 : i32
    %c0_i32 = arith.constant 0 : i32
    %20 = arith.cmpi eq, %c4_i32, %c0_i32 : i32
    %c1_i32 = arith.constant 1 : i32
    %21 = arith.select %20, %c1_i32, %c4_i32 : i32
    %22 = vector.broadcast %21 : i32 to vector<24x128xi32>
    %23 = arith.remsi %19, %22 : vector<24x128xi32>
    %c0_i32_13 = arith.constant 0 : i32
    %24 = vector.broadcast %c0_i32_13 : i32 to vector<24x128xi32>
    %25 = arith.cmpi ne, %23, %24 : vector<24x128xi32>
    %c0_i32_14 = arith.constant 0 : i32
    %26 = vector.broadcast %c0_i32_14 : i32 to vector<24x128xi32>
    %27 = arith.cmpi slt, %23, %26 : vector<24x128xi32>
    %c0_i32_15 = arith.constant 0 : i32
    %28 = arith.cmpi slt, %21, %c0_i32_15 : i32
    %29 = vector.broadcast %28 : i1 to vector<24x128xi1>
    %30 = vector.broadcast %29 : vector<24x128xi1> to vector<24x128xi1>
    %31 = arith.xori %27, %30 : vector<24x128xi1>
    %32 = arith.andi %31, %25 : vector<24x128xi1>
    %33 = vector.broadcast %21 : i32 to vector<24x128xi32>
    %34 = arith.addi %23, %33 : vector<24x128xi32>
    %35 = arith.select %32, %34, %23 : vector<24x128xi1>, vector<24x128xi32>
    %c0_i32_16 = arith.constant 0 : i32
    %36 = vector.broadcast %c0_i32_16 : i32 to vector<24x128xi32>
    %37 = arith.cmpi ne, %35, %36 : vector<24x128xi32>
    %c3_i32_17 = arith.constant 3 : i32
    %38 = vector.broadcast %c3_i32_17 : i32 to vector<24x128xi32>
    %39 = arith.cmpi ne, %35, %38 : vector<24x128xi32>
    %c0_i32_18 = arith.constant 0 : i32
    %40 = arith.index_cast %c0_i32_18 : i32 to index
    %c2 = arith.constant 2 : index
    %c0_19 = arith.constant 0 : index
    %41 = vector.load %arg6[%40, %c2, %c0_19] : memref<1x32x128xf32, #tpu.memory_space<vmem>>, vector<1x17x128xf32>
    %42 = vector.shape_cast %41 : vector<1x17x128xf32> to vector<17x128xf32>
    %43 = vector.extract_strided_slice %37 {offsets = [0, 0], sizes = [17, 128], strides = [1, 1]} : vector<24x128xi1> to vector<17x128xi1>
    %cst_20 = arith.constant 0.000000e+00 : f32
    %44 = vector.broadcast %cst_20 : f32 to vector<17x128xf32>
    %45 = arith.select %43, %42, %44 : vector<17x128xi1>, vector<17x128xf32>
    %46 = vector.broadcast %7 : vector<1x128xf32> to vector<17x128xf32>
    %47 = arith.mulf %45, %46 : vector<17x128xf32>
    %48 = arith.index_cast %c0_i32_18 : i32 to index
    %c3 = arith.constant 3 : index
    %c0_21 = arith.constant 0 : index
    %49 = vector.load %arg6[%48, %c3, %c0_21] : memref<1x32x128xf32, #tpu.memory_space<vmem>>, vector<1x17x128xf32>
    %50 = vector.shape_cast %49 : vector<1x17x128xf32> to vector<17x128xf32>
    %51 = vector.broadcast %8 : vector<1x128xf32> to vector<17x128xf32>
    %52 = arith.mulf %50, %51 : vector<17x128xf32>
    %53 = arith.addf %47, %52 : vector<17x128xf32>
    %54 = arith.index_cast %c0_i32_18 : i32 to index
    %c4 = arith.constant 4 : index
    %c0_22 = arith.constant 0 : index
    %55 = vector.load %arg6[%54, %c4, %c0_22] : memref<1x32x128xf32, #tpu.memory_space<vmem>>, vector<1x17x128xf32>
    %56 = vector.shape_cast %55 : vector<1x17x128xf32> to vector<17x128xf32>
    %57 = vector.extract_strided_slice %39 {offsets = [0, 0], sizes = [17, 128], strides = [1, 1]} : vector<24x128xi1> to vector<17x128xi1>
    %cst_23 = arith.constant 0.000000e+00 : f32
    %58 = vector.broadcast %cst_23 : f32 to vector<17x128xf32>
    %59 = arith.select %57, %56, %58 : vector<17x128xi1>, vector<17x128xf32>
    %60 = vector.broadcast %9 : vector<1x128xf32> to vector<17x128xf32>
    %61 = arith.mulf %59, %60 : vector<17x128xf32>
    %62 = arith.addf %53, %61 : vector<17x128xf32>
    %63 = arith.index_cast %c0_i32_18 : i32 to index
    %c6 = arith.constant 6 : index
    %c0_24 = arith.constant 0 : index
    %64 = vector.load %arg6[%63, %c6, %c0_24] : memref<1x32x128xf32, #tpu.memory_space<vmem>>, vector<1x17x128xf32>
    %65 = vector.shape_cast %64 : vector<1x17x128xf32> to vector<17x128xf32>
    %66 = vector.extract_strided_slice %37 {offsets = [0, 0], sizes = [17, 128], strides = [1, 1]} : vector<24x128xi1> to vector<17x128xi1>
    %cst_25 = arith.constant 0.000000e+00 : f32
    %67 = vector.broadcast %cst_25 : f32 to vector<17x128xf32>
    %68 = arith.select %66, %65, %67 : vector<17x128xi1>, vector<17x128xf32>
    %69 = vector.broadcast %10 : vector<1x128xf32> to vector<17x128xf32>
    %70 = arith.mulf %68, %69 : vector<17x128xf32>
    %71 = arith.addf %62, %70 : vector<17x128xf32>
    %72 = arith.index_cast %c0_i32_18 : i32 to index
    %c7 = arith.constant 7 : index
    %c0_26 = arith.constant 0 : index
    %73 = vector.load %arg6[%72, %c7, %c0_26] : memref<1x32x128xf32, #tpu.memory_space<vmem>>, vector<1x17x128xf32>
    %74 = vector.shape_cast %73 : vector<1x17x128xf32> to vector<17x128xf32>
    %75 = vector.broadcast %11 : vector<1x128xf32> to vector<17x128xf32>
    %76 = arith.mulf %74, %75 : vector<17x128xf32>
    %77 = arith.addf %71, %76 : vector<17x128xf32>
    %78 = arith.index_cast %c0_i32_18 : i32 to index
    %c8_27 = arith.constant 8 : index
    %c0_28 = arith.constant 0 : index
    %79 = vector.load %arg6[%78, %c8_27, %c0_28] : memref<1x32x128xf32, #tpu.memory_space<vmem>>, vector<1x17x128xf32>
    %80 = vector.shape_cast %79 : vector<1x17x128xf32> to vector<17x128xf32>
    %81 = vector.extract_strided_slice %39 {offsets = [0, 0], sizes = [17, 128], strides = [1, 1]} : vector<24x128xi1> to vector<17x128xi1>
    %cst_29 = arith.constant 0.000000e+00 : f32
    %82 = vector.broadcast %cst_29 : f32 to vector<17x128xf32>
    %83 = arith.select %81, %80, %82 : vector<17x128xi1>, vector<17x128xf32>
    %84 = vector.broadcast %12 : vector<1x128xf32> to vector<17x128xf32>
    %85 = arith.mulf %83, %84 : vector<17x128xf32>
    %86 = arith.addf %77, %85 : vector<17x128xf32>
    %87 = arith.index_cast %c0_i32_18 : i32 to index
    %c10 = arith.constant 10 : index
    %c0_30 = arith.constant 0 : index
    %88 = vector.load %arg6[%87, %c10, %c0_30] : memref<1x32x128xf32, #tpu.memory_space<vmem>>, vector<1x17x128xf32>
    %89 = vector.shape_cast %88 : vector<1x17x128xf32> to vector<17x128xf32>
    %90 = vector.extract_strided_slice %37 {offsets = [0, 0], sizes = [17, 128], strides = [1, 1]} : vector<24x128xi1> to vector<17x128xi1>
    %cst_31 = arith.constant 0.000000e+00 : f32
    %91 = vector.broadcast %cst_31 : f32 to vector<17x128xf32>
    %92 = arith.select %90, %89, %91 : vector<17x128xi1>, vector<17x128xf32>
    %93 = vector.broadcast %13 : vector<1x128xf32> to vector<17x128xf32>
    %94 = arith.mulf %92, %93 : vector<17x128xf32>
    %95 = arith.addf %86, %94 : vector<17x128xf32>
    %96 = arith.index_cast %c0_i32_18 : i32 to index
    %c11 = arith.constant 11 : index
    %c0_32 = arith.constant 0 : index
    %97 = vector.load %arg6[%96, %c11, %c0_32] : memref<1x32x128xf32, #tpu.memory_space<vmem>>, vector<1x17x128xf32>
    %98 = vector.shape_cast %97 : vector<1x17x128xf32> to vector<17x128xf32>
    %99 = vector.broadcast %14 : vector<1x128xf32> to vector<17x128xf32>
    %100 = arith.mulf %98, %99 : vector<17x128xf32>
    %101 = arith.addf %95, %100 : vector<17x128xf32>
    %102 = arith.index_cast %c0_i32_18 : i32 to index
    %c12 = arith.constant 12 : index
    %c0_33 = arith.constant 0 : index
    %103 = vector.load %arg6[%102, %c12, %c0_33] : memref<1x32x128xf32, #tpu.memory_space<vmem>>, vector<1x17x128xf32>
    %104 = vector.shape_cast %103 : vector<1x17x128xf32> to vector<17x128xf32>
    %105 = vector.extract_strided_slice %39 {offsets = [0, 0], sizes = [17, 128], strides = [1, 1]} : vector<24x128xi1> to vector<17x128xi1>
    %cst_34 = arith.constant 0.000000e+00 : f32
    %106 = vector.broadcast %cst_34 : f32 to vector<17x128xf32>
    %107 = arith.select %105, %104, %106 : vector<17x128xi1>, vector<17x128xf32>
    %108 = vector.broadcast %15 : vector<1x128xf32> to vector<17x128xf32>
    %109 = arith.mulf %107, %108 : vector<17x128xf32>
    %110 = arith.addf %101, %109 : vector<17x128xf32>
    %111 = vector.broadcast %16 : vector<1x128xf32> to vector<17x128xf32>
    %112 = arith.addf %110, %111 : vector<17x128xf32>
    %113 = arith.index_cast %c0_i32_18 : i32 to index
    %c0_35 = arith.constant 0 : index
    %c0_36 = arith.constant 0 : index
    %114 = vector.load %arg5[%113, %c0_35, %c0_36] : memref<1x17x128xf32, #tpu.memory_space<vmem>>, vector<1x17x128xf32>
    %115 = vector.shape_cast %114 : vector<1x17x128xf32> to vector<17x128xf32>
    %116 = vector.shape_cast %112 : vector<17x128xf32> to vector<1x17x128xf32>
    tpu.vector_store %arg5[%113, %c0_35, %c0_36], %116 {strides = array<i32>} : memref<1x17x128xf32, #tpu.memory_space<vmem>>, vector<1x17x128xf32>,
    %c1_i32_37 = arith.constant 1 : i32
    %c0_38 = arith.constant 0 : index
    %c0_39 = arith.constant 0 : index
    %c0_40 = arith.constant 0 : index
    %117 = vector.load %arg2[%c0_38, %c0_39, %c0_40] : memref<1x17x128xf32, #tpu.memory_space<vmem>>, vector<1x1x128xf32>
    %c0_41 = arith.constant 0 : index
    %c0_42 = arith.constant 0 : index
    %c0_43 = arith.constant 0 : index
    %118 = vector.load %arg5[%c0_41, %c0_42, %c0_43] : memref<1x17x128xf32, #tpu.memory_space<vmem>>, vector<1x1x128xf32>
    tpu.vector_store %arg5[%c0_41, %c0_42, %c0_43], %117 {strides = array<i32>} : memref<1x17x128xf32, #tpu.memory_space<vmem>>, vector<1x1x128xf32>,
    return
  }
  func.func @transform_0(%arg0: i32, %arg1: i32) -> (i32, i32, i32) {
    %c0_i32 = arith.constant 0 : i32
    %c0_i32_0 = arith.constant 0 : i32
    return %arg0, %c0_i32, %arg1 : i32, i32, i32
  }
  func.func @transform_1(%arg0: i32, %arg1: i32) -> (i32, i32) {
    %c0_i32 = arith.constant 0 : i32
    %c0_i32_0 = arith.constant 0 : i32
    return %c0_i32, %arg1 : i32, i32
  }
  func.func @transform_2(%arg0: i32, %arg1: i32) -> (i32, i32) {
    %c0_i32 = arith.constant 0 : i32
    %c0_i32_0 = arith.constant 0 : i32
    return %c0_i32, %arg1 : i32, i32
  }
  func.func @transform_3(%arg0: i32, %arg1: i32) -> (i32, i32, i32) {
    %c0_i32 = arith.constant 0 : i32
    %c0_i32_0 = arith.constant 0 : i32
    return %arg0, %c0_i32, %arg1 : i32, i32, i32
  }
}

</mosaic_0001>

<bundles_post_ra>
// kernel: tpu_custom_call.1
= control target key start
LH: loop header
LB: loop body
LE: loop exit
PB: predicated region body
PF: predicated region fallthrough
CT: control target
= control target key end

     0   :  { %s599_s12 = smov 0   ;;  %s601_s13 = smov 0   ;;  %s746_s0 = inlined_call_operand.vmem [shape: f32[2,17,128], index: 0, kind: input, shape index: {}]   ;;  %s747_s1 = inlined_call_operand.vmem [shape: f32[9,128], index: 1, kind: input, shape index: {}]   ;;  %s748_s2 = inlined_call_operand.vmem [shape: f32[1,128], index: 2, kind: input, shape index: {}]   ;;  %s749_s3 = inlined_call_operand.vmem [shape: f32[2,17,128], index: 3, kind: output, shape index: {}]  }
   0x1   :  { %s603_s14 = smov 0  }
   0x2 LB: > { %s25_s15 = sadd.s32 1, %s572_s13  ;;  %p521_p0 = scmp.ge.s32.totalorder %s576_s14, 1  ;;  %s576_s14 = sphi %s603_s14, %s13_s14   ;;  %s572_s13 = sphi %s601_s13, %s763_s13   ;;  %s568_s12 = sphi %s599_s12, %s762_s12  }
   0x3   : > { %p27_p1 = scmp.ge.s32.totalorder %s25_s15, 2  ;;  %p173_p2 = scmp.lt.s32.totalorder %s576_s14, 3 }
   0x5   : > { %s765_s15 = smov (%p27_p1, %s25_s15), 0  ;;  %p174_p3 = pnand %p521_p0, %p173_p2 }
   0x6   : > { %p210_p4 = scmp.lt.s32.totalorder (!%p174_p3), %s568_s12, 1 }
   0x7   : > { %177 = sbr.rel (%p174_p3) target bundleno = 53 (0x35), region = 32 }
   0xc   : > { %v242_v0 = vlaneseq  ;;  %v578_v1 = vmov 0.0   ;;  %s767_s12 = smov (!%p210_p4, %s568_s12), 1  ;;  %v239_v9 = vld [vmem:[%s747_s1] sm:$0xff] }
   0xd   : > { %233 = vst [vmem:[#allocation2] sm:$0xff] %v578_v1  ;;  %s526_s16 = smul.u32 24, %s767_s12  ;;  %v304_v12 = vperm.slane %v239_v9, 1  ;;  %v297_v16 = vperm.slane %v239_v9, 0  ;;  %v317_v22 = vperm.slane %v239_v9, 2  ;;  %v648_v23 = vperm.slane %v239_v9, 3 }
   0xe   : > { %234 = vst [vmem:[#allocation2 + $0x18] sm:$0xff] %v578_v1  ;;  %v243_v2 = vshrl.u32 %v242_v0, 7  ;;  %v650_v24 = vperm.slane %v239_v9, 5  ;;  %v668_v39 = vperm.slane %v239_v9, 4  ;;  %v672_v44 = vperm.slane %v239_v9, 6 }
   0xf   : > { %s625_s19 = scalar_lea.vmem %s746_s0, %s526_s16  ;;  %v676_v49 = vperm.slane %v239_v9, 7  ;;  %s232_s28 = scalar_lea.vmem %s749_s3, %s526_s16 }
  0x10   : > { %v244_v3 = vadd.s32 8, %v243_v2  ;;  %v246_v4 = vadd.s32 3, %v243_v2  ;;  %v235_v6 = vld [vmem:[%s625_s19 + $0x1] sm:$0xff]  ;;  %v236_v7 = vld [vmem:[%s625_s19 + $0x9] sm:$0xff]  ;;  %v245_v8 = vadd.s32 16, %v243_v2 }
  0x11   : > { %237 = vst [vmem:[#allocation2 + $0x8] sm:$0xff] %v235_v6 }
  0x12   : > { %v247_v5 = vadd.s32 3, %v244_v3  ;;  %238 = vst [vmem:[#allocation2 + $0x10] sm:$0xff] %v236_v7  ;;  %v253_v10 = vand.u32 3, %v246_v4  ;;  %v248_v13 = vadd.s32 3, %v245_v8 }
  0x14   : > { %v260_v11 = vand.u32 3, %v247_v5  ;;  %vm632_vm0 = vcmp.ne.s32.totalorder %v253_v10, 0  ;;  %vm636_vm1 = vcmp.ne.s32.totalorder %v253_v10, 3  ;;  %v267_v31 = vand.u32 3, %v248_v13 }
  0x15   : > { %v350_v40 = vsel %vm636_vm1, %v235_v6, 0.0  ;;  %v349_v5 = vld [vmem:[#allocation2 + $0x18] sm:$0x1]  ;;  %v361_v10 = vld [vmem:[#allocation2 + $0x1a] sm:$0x1] }
  0x16   : > { %vm640_vm2 = vcmp.ne.s32.totalorder %v260_v11, 0  ;;  %vm644_vm3 = vcmp.ne.s32.totalorder %v260_v11, 3  ;;  %vm678_vm4 = vcmp.ne.s32.totalorder %v267_v31, 0  ;;  %v354_v54 = vmul.f32 %v650_v24, %v350_v40  ;;  %v382_v50 = vld [vmem:[#allocation2 + $0x1c] sm:$0x1] }
  0x17   : > { %v351_v45 = vsel %vm644_vm3, %v236_v7, 0.0  ;;  %vm688_vm5 = vcmp.ne.s32.totalorder %v267_v31, 3 }
  0x18   : > { %v291_v19 = vld [vmem:[#allocation2 + $0x2] sm:$0xff]  ;;  %v355_v60 = vmul.f32 %v650_v24, %v351_v45 }
  0x19   : > { %v301_v20 = vld [vmem:[#allocation2 + $0x3] sm:$0xff]  ;;  %v294_v26 = vsel %vm632_vm0, %v291_v19, 0.0  ;;  %v654_v27 = vld [vmem:[#allocation2 + $0xb] sm:$0xff]  ;;  %v303_v57 = vld [vmem:[#allocation2 + $0x13] sm:$0x1] }
  0x1a   : > { %v311_v21 = vld [vmem:[#allocation2 + $0x4] sm:$0xff]  ;;  %v305_v28 = vmul.f32 %v304_v12, %v301_v20  ;;  %v656_v29 = vld [vmem:[#allocation2 + $0xc] sm:$0xff]  ;;  %v298_v33 = vmul.f32 %v297_v16, %v294_v26  ;;  %v306_v34 = vmul.f32 %v304_v12, %v654_v27  ;;  %v313_v63 = vld [vmem:[#allocation2 + $0x14] sm:$0x1]  ;;  %v307_v9 = vmul.f32 %v304_v12, %v303_v57 }
  0x1b   : > { %v292_v25 = vld [vmem:[#allocation2 + $0xa] sm:$0xff]  ;;  %v314_v30 = vsel %vm636_vm1, %v311_v21, 0.0  ;;  %v315_v35 = vsel %vm644_vm3, %v656_v29, 0.0  ;;  %v293_v51 = vld [vmem:[#allocation2 + $0x12] sm:$0x1]  ;;  %v316_v19 = vsel %vm688_vm5, %v313_v63, 0.0 }
  0x1c   : > { %v295_v32 = vsel %vm640_vm2, %v292_v25, 0.0  ;;  %v324_v36 = vld [vmem:[#allocation2 + $0x6] sm:$0xff]  ;;  %v325_v41 = vld [vmem:[#allocation2 + $0xe] sm:$0xff]  ;;  %v308_v42 = vadd.f32 %v305_v28, %v298_v33  ;;  %v318_v43 = vmul.f32 %v317_v22, %v314_v30  ;;  %v319_v47 = vmul.f32 %v317_v22, %v315_v35  ;;  %v326_v0 = vld [vmem:[#allocation2 + $0x16] sm:$0x1] }
  0x1d   : > { %v299_v37 = vmul.f32 %v297_v16, %v295_v32  ;;  %v327_v38 = vsel %vm632_vm0, %v324_v36, 0.0  ;;  %v337_v48 = vld [vmem:[#allocation2 + $0x7] sm:$0xff]  ;;  %v328_v55 = vsel %vm640_vm2, %v325_v41, 0.0  ;;  %v338_v56 = vld [vmem:[#allocation2 + $0xf] sm:$0xff]  ;;  %v362_v3 = vsel %vm632_vm0, %v292_v25, 0.0 }
  0x1e   : > { %v321_v52 = vadd.f32 %v318_v43, %v308_v42  ;;  %v331_v53 = vmul.f32 %v648_v23, %v327_v38  ;;  %v332_v59 = vmul.f32 %v648_v23, %v328_v55  ;;  %v360_v61 = vld [vmem:[#allocation2 + $0x12] sm:$0xff]  ;;  %v341_v2 = vmul.f32 %v668_v39, %v337_v48  ;;  %v552_v20 = vld [vmem:[%s747_s1 + $0x8] ss:$0 sm:$0xff] }
  0x1f   : > { %v309_v46 = vadd.f32 %v306_v34, %v299_v37  ;;  %v296_v4 = vsel %vm678_vm4, %v293_v51, 0.0  ;;  %v342_v7 = vmul.f32 %v668_v39, %v338_v56  ;;  %v363_v13 = vsel %vm640_vm2, %v360_v61, 0.0  ;;  %v381_v25 = vld [vmem:[#allocation2 + $0x14] sm:$0xff] }
  0x20   : > { %v334_v1 = vadd.f32 %v331_v53, %v321_v52  ;;  %v300_v8 = vmul.f32 %v297_v16, %v296_v4  ;;  %v329_v14 = vsel %vm678_vm4, %v326_v0, 0.0  ;;  %v320_v16 = vmul.f32 %v317_v22, %v316_v19  ;;  %v372_v31 = vld [vmem:[#allocation2 + $0x13] sm:$0xff]  ;;  %v373_v51 = vld [vmem:[#allocation2 + $0x1b] sm:$0x1] }
  0x21   : > { %v322_v58 = vadd.f32 %v319_v47, %v309_v46  ;;  %v352_v12 = vsel %vm688_vm5, %v349_v5, 0.0  ;;  %v366_v17 = vmul.f32 %v672_v44, %v362_v3  ;;  %v383_v30 = vsel %vm636_vm1, %v656_v29, 0.0  ;;  %v339_v32 = vld [vmem:[#allocation2 + $0x17] sm:$0x1] }
  0x22   : > { %v344_v11 = vadd.f32 %v341_v2, %v334_v1  ;;  %v310_v26 = vadd.f32 %v307_v9, %v300_v8  ;;  %v364_v33 = vsel %vm678_vm4, %v361_v10, 0.0  ;;  %v367_v35 = vmul.f32 %v672_v44, %v363_v13 }
  0x23   : > { %v335_v6 = vadd.f32 %v332_v59, %v322_v58  ;;  %v333_v22 = vmul.f32 %v648_v23, %v329_v14  ;;  %v375_v38 = vmul.f32 %v676_v49, %v654_v27  ;;  %v384_v40 = vsel %vm644_vm3, %v381_v25, 0.0  ;;  %v553_v23 = vld [vmem:[%s748_s2] ss:$0 sm:$0xff] }
  0x24   : > { %v357_v28 = vadd.f32 %v354_v54, %v344_v11  ;;  %v323_v36 = vadd.f32 %v320_v16, %v310_v26  ;;  %v356_v15 = vmul.f32 %v650_v24, %v352_v12  ;;  %v376_v41 = vmul.f32 %v676_v49, %v372_v31  ;;  %v402_v58 = vld [vmem:[%s625_s19] sm:$0x1] }
  0x25   : > { %v345_v21 = vadd.f32 %v342_v7, %v335_v6  ;;  %v343_v43 = vmul.f32 %v668_v39, %v339_v32  ;;  %v387_v46 = vmul.f32 %v552_v20, %v383_v30  ;;  %v388_v47 = vmul.f32 %v552_v20, %v384_v40 }
  0x26   : > { %v369_v37 = vadd.f32 %v366_v17, %v357_v28  ;;  %v336_v42 = vadd.f32 %v333_v22, %v323_v36  ;;  %v368_v48 = vmul.f32 %v672_v44, %v364_v33  ;;  %v385_v54 = vsel %vm688_vm5, %v382_v50, 0.0 }
  0x27   : > { %v358_v34 = vadd.f32 %v355_v60, %v345_v21  ;;  %v377_v57 = vmul.f32 %v676_v49, %v373_v51  ;;  %v389_v59 = vmul.f32 %v552_v20, %v385_v54 }
  0x28   : > { %v378_v45 = vadd.f32 %v375_v38, %v369_v37  ;;  %v346_v18 = vadd.f32 %v343_v43, %v336_v42 }
  0x29   : > { %v370_v29 = vadd.f32 %v367_v35, %v358_v34 }
  0x2a   : > { %v390_v24 = vadd.f32 %v387_v46, %v378_v45  ;;  %v359_v52 = vadd.f32 %v356_v15, %v346_v18 }
  0x2b   : > { %v379_v27 = vadd.f32 %v376_v41, %v370_v29 }
  0x2c   : > { %v396_v53 = vadd.f32 %v553_v23, %v390_v24  ;;  %v371_v56 = vadd.f32 %v368_v48, %v359_v52 }
  0x2d   : > { %v391_v39 = vadd.f32 %v388_v47, %v379_v27 }
  0x2e   : > { %399 = vst [vmem:[%s232_s28] sm:$0xff] %v396_v53  ;;  %v380_v44 = vadd.f32 %v377_v57, %v371_v56 }
  0x2f   : > { %v397_v55 = vadd.f32 %v553_v23, %v391_v39  ;;  %403 = vst [vmem:[%s232_s28] sm:$0x1] %v402_v58 }
  0x30   : > { %v392_v60 = vadd.f32 %v389_v59, %v380_v44 }
  0x31   : > { %400 = vst [vmem:[%s232_s28 + $0x8] sm:$0xff] %v397_v55 }
  0x32   : > { %v398_v61 = vadd.f32 %v553_v23, %v392_v60 }
  0x34   : > { %401 = vst [vmem:[%s232_s28 + $0x10] sm:$0x1] %v398_v61 }
  0x35 PF: > { %s13_s14 = sadd.s32 1, %s576_s14   ;;  %s762_s12 = smov %s572_s13 }
  0x36   : > { %p10_p5 = scmp.ge.s32.totalorder %s13_s14, 4   ;;  %s763_s13 = smov %s765_s15 }
  0x38   :  { %12 = sbr.rel (!%p10_p5) target bundleno = 2 (0x2), region = 68 }

</bundles_post_ra>
